<compile_context>
chip_gen: v7x
topology: tpu7x:2x2x1
jax: 0.10.0
libtpu: 0.0.40
codegen_flags: <defaults>
</compile_context>

<pallas_src>
import jax
import jax.numpy as jnp
from jax.experimental import pallas as pl
from jax.experimental.pallas import tpu as pltpu


def _round_up(x, m):
    return (x + m - 1) // m * m


def _pick_tile_b(B, max_tb=256):
    """Batch tile: big MXU fill, but >=2 tiles (v7x two-TC sharding) when possible."""
    Bp8 = _round_up(B, 8)
    if Bp8 <= 8:
        return 8
    if Bp8 >= 2 * max_tb:
        return max_tb
    return _round_up((Bp8 + 1) // 2, 8)


# ---------------------------------------------------------------------------
# Fused kernel.  grid = (batch tiles,) ; weight + epilogue constants resident.
#   e   = x @ w'                       (bf16 MXU, f32 accumulate; bias folded
#                                       into centers, norm + sqrt(0.5/var)
#                                       folded into w')
#   sq  = max(||e||^2 + ||c'||^2 - 2 e.c', 0)
#   s   = exp(-sq)                     (EUP)
#   out = s @ pool                     (per-class sum over K clusters)
# ---------------------------------------------------------------------------
def _magnet_fused_kernel(x_ref, w_ref, ct_ref, c2_ref, pool_ref, o_ref):
    e = jnp.dot(x_ref[...], w_ref[...],
                preferred_element_type=jnp.float32)             # [TB, Dp] f32
    e2 = jnp.sum(e * e, axis=1, keepdims=True)                  # [TB, 1]  (XLU)
    cross = jnp.dot(e.astype(jnp.bfloat16), ct_ref[...],
                    preferred_element_type=jnp.float32)         # [TB, Cp]
    sq = jnp.maximum(e2 + c2_ref[...] - 2.0 * cross, 0.0)       # squared dist
    s = jnp.exp(-sq)                                            # EUP slot
    o_ref[...] = jnp.dot(s.astype(jnp.bfloat16), pool_ref[...],
                         preferred_element_type=jnp.float32)    # [TB, NCp]


# ---------------------------------------------------------------------------
# Host-side parameter folding / padding (done once per parameter set).
# ---------------------------------------------------------------------------
def prepare_magnet_params(w, b, mean_flat, std_flat, cluster_centers, variance,
                          num_classes, K):
    F, D = w.shape
    C = cluster_centers.shape[0]

    # Fold -0.5/variance into the distance by scaling both operands.
    a = jnp.sqrt(0.5 / variance).astype(jnp.float32)

    inv_std = 1.0 / std_flat                                  # [1, F]
    w_fold = (w * inv_std.reshape(F, 1)) * a                  # norm + scale folded
    b_fold = (b - (mean_flat * inv_std) @ w) * a              # [1, D]
    # Fold bias into centers: ||x@w' + b' - a*c||^2 == ||x@w' - (a*c - b')||^2
    cen = cluster_centers * a - b_fold                        # [C, D]

    Fp = _round_up(F, 128)
    Dp = _round_up(D, 128)
    Cp = _round_up(C, 128)
    NCp = _round_up(num_classes, 128)                         # lane-dense output

    w_p = jnp.zeros((Fp, Dp), jnp.float32).at[:F, :D].set(w_fold)
    w_p = w_p.astype(jnp.bfloat16)                            # halved resident footprint
    cen_p = jnp.zeros((Cp, Dp), jnp.float32).at[:C, :D].set(cen)
    ct = jnp.asarray(cen_p.T).astype(jnp.bfloat16)            # [Dp, Cp] pre-transposed
    c2 = jnp.sum(cen_p * cen_p, axis=1).reshape(1, Cp)        # ||c'||^2 (f32, exact)

    # Per-class pooling matrix: pool[c, cls] = 1 iff c // K == cls and c < C.
    cls_of_cluster = jnp.arange(Cp) // K
    pool = (cls_of_cluster[:, None] == jnp.arange(NCp)[None, :]) \
        & (jnp.arange(Cp)[:, None] < C)
    pool = pool.astype(jnp.bfloat16)                          # 0/1 exact in bf16

    return {
        "w": w_p, "ct": ct, "c2": c2, "pool": pool,
        "F": F, "Fp": Fp, "Dp": Dp, "Cp": Cp, "NCp": NCp,
        "num_classes": num_classes, "K": K,
    }


# ---------------------------------------------------------------------------
# Wrapper reproducing MagnetModelWrapper.forward
# (return_scores=True, normalize_probs=False path).
# ---------------------------------------------------------------------------
def magnet_model_wrapper_forward(x, prep):
    B = x.shape[0]
    F, Fp, Dp, Cp, NCp = prep["F"], prep["Fp"], prep["Dp"], prep["Cp"], prep["NCp"]

    TB = _pick_tile_b(B)
    Bp = _round_up(B, TB)

    # Cast to bf16 BEFORE padding -> no padded f32 intermediate in HBM.
    x_flat = x.reshape(B, -1).astype(jnp.bfloat16)            # NCHW row-major flatten
    pad_b, pad_f = Bp - B, Fp - F
    if pad_b or pad_f:
        x_flat = jnp.pad(x_flat, ((0, pad_b), (0, pad_f)))

    grid = (Bp // TB,)

    # Explicit VMEM budget (conservatively counts 2 buffers per operand even
    # though constant-index blocks are not re-DMA'd between grid steps).
    vmem_est = (
        2 * TB * Fp * 2       # x tiles (bf16)
        + 2 * TB * NCp * 4    # out tiles (f32)
        + 2 * Fp * Dp * 2     # resident weight (bf16)
        + 2 * Dp * Cp * 2     # centers^T (bf16)
        + 2 * Cp * 4          # ||c||^2 (f32)
        + 2 * Cp * NCp * 2    # pooling matrix (bf16)
    )
    # TODO(synk): if this ever exceeds the v7x budget (64 MiB physical), switch
    # to an F-reduction grid axis with an f32 accumulator instead of a resident
    # weight.  Constant-index epilogue inputs could also use pl.Buffered(1).
    assert vmem_est < 48 * 1024 * 1024, "weight/tile footprint exceeds v7x VMEM budget"
    vmem_limit = min(48 * 1024 * 1024, max(32 * 1024 * 1024, 2 * vmem_est))

    out = pl.pallas_call(
        _magnet_fused_kernel,
        out_shape=jax.ShapeDtypeStruct((Bp, NCp), jnp.float32),
        grid_spec=pltpu.PrefetchScalarGridSpec(
            num_scalar_prefetch=0,
            grid=grid,
            in_specs=[
                pl.BlockSpec((TB, Fp), lambda i: (i, 0)),      # x tile    (bf16)
                pl.BlockSpec((Fp, Dp), lambda i: (0, 0)),      # weight    (bf16, resident)
                pl.BlockSpec((Dp, Cp), lambda i: (0, 0)),      # centers^T (bf16, resident)
                pl.BlockSpec((1, Cp), lambda i: (0, 0)),       # ||c||^2   (f32,  resident)
                pl.BlockSpec((Cp, NCp), lambda i: (0, 0)),     # pooling   (bf16, resident)
            ],
            out_specs=pl.BlockSpec((TB, NCp), lambda i: (i, 0)),
        ),
        compiler_params=pltpu.CompilerParams(
            dimension_semantics=("parallel",),                 # batch shards on v7x TCs
            vmem_limit_bytes=vmem_limit,
        ),
    )(x_flat, prep["w"], prep["ct"], prep["c2"], prep["pool"])

    return out[:B, :prep["num_classes"]]


# ---------------------------------------------------------------------------
# Pure-JAX reference (unfolded, full f32) for sanity checking.
# ---------------------------------------------------------------------------
def _reference(x, mean_flat, std_flat, w, b, centers, variance, num_classes, K):
    B = x.shape[0]
    xn = (x.reshape(B, -1) - mean_flat) / std_flat
    emb = xn @ w + b
    diff = emb[:, None, :] - centers[None, :, :]
    sq = jnp.sum(diff * diff, axis=-1) / variance
    s = jnp.exp(-0.5 * sq)
    return s.reshape(B, num_classes, K).sum(axis=2)


if __name__ == "__main__":
    # Small shapes consistent with the module (3-channel images).
    B, Cin, H, W = 2, 3, 16, 16
    D = 32                      # embedding dim of the synthetic backbone
    NUM_CLASSES, K = 4, 2       # num_clusters = NUM_CLASSES * K
    F = Cin * H * W

    key = jax.random.PRNGKey(0)
    kx, kw, kb, kc = jax.random.split(key, 4)

    x = jax.random.normal(kx, (B, Cin, H, W), dtype=jnp.float32)

    mean = jnp.array([0.4914, 0.4822, 0.4465], dtype=jnp.float32)
    std = jnp.array([0.2023, 0.1994, 0.2010], dtype=jnp.float32)
    # expand per-channel stats to the flattened NCHW layout: [1, Cin*H*W]
    mean_flat = jnp.repeat(mean, H * W).reshape(1, F)
    std_flat = jnp.repeat(std, H * W).reshape(1, F)

    w = 0.003 * jax.random.normal(kw, (F, D), dtype=jnp.float32)
    b = 0.01 * jax.random.normal(kb, (1, D), dtype=jnp.float32)
    centers = 0.5 * jax.random.normal(kc, (NUM_CLASSES * K, D), dtype=jnp.float32)
    variance = jnp.float32(16.0)

    prep = prepare_magnet_params(w, b, mean_flat, std_flat, centers, variance,
                                 NUM_CLASSES, K)

    out = magnet_model_wrapper_forward(x, prep)
    out = jax.block_until_ready(out)

    ref = _reference(x, mean_flat, std_flat, w, b, centers, variance,
                     NUM_CLASSES, K)
    assert out.shape == (B, NUM_CLASSES), out.shape
    assert jnp.allclose(out, ref, rtol=3e-2, atol=3e-3), (out, ref)

    print("KERNEL_OK")
</pallas_src>

<mosaic_0001>
module attributes {stable_mosaic.version = 11 : i64} {
  func.func @_magnet_fused_kernel(%arg0: i32, %arg1: memref<8x768xbf16, #tpu.memory_space<vmem>>, %arg2: memref<768x128xbf16, #tpu.memory_space<vmem>>, %arg3: memref<128x128xbf16, #tpu.memory_space<vmem>>, %arg4: memref<1x128xf32, #tpu.memory_space<vmem>>, %arg5: memref<128x128xbf16, #tpu.memory_space<vmem>>, %arg6: memref<8x128xf32, #tpu.memory_space<vmem>>) attributes {dimension_semantics = [#tpu.dimension_semantics<parallel>], iteration_bounds = array<i64: 1>, scalar_prefetch = 0 : i64, scratch_operands = 0 : i64, tpu.core_type = #tpu.core_type<tc>, window_params = [{transform_indices = @transform_0, window_bounds = array<i64: 8, 768>}, {pipeline_mode = #tpu.pipeline_mode<synchronous>, transform_indices = @transform_1, window_bounds = array<i64: 768, 128>}, {pipeline_mode = #tpu.pipeline_mode<synchronous>, transform_indices = @transform_2, window_bounds = array<i64: 128, 128>}, {pipeline_mode = #tpu.pipeline_mode<synchronous>, transform_indices = @transform_3, window_bounds = array<i64: 1, 128>}, {pipeline_mode = #tpu.pipeline_mode<synchronous>, transform_indices = @transform_4, window_bounds = array<i64: 128, 128>}, {transform_indices = @transform_5, window_bounds = array<i64: 8, 128>}]} {
    %c0 = arith.constant 0 : index
    %c0_0 = arith.constant 0 : index
    %0 = vector.load %arg1[%c0, %c0_0] : memref<8x768xbf16, #tpu.memory_space<vmem>>, vector<8x768xbf16>
    %c0_1 = arith.constant 0 : index
    %c0_2 = arith.constant 0 : index
    %1 = vector.load %arg2[%c0_1, %c0_2] : memref<768x128xbf16, #tpu.memory_space<vmem>>, vector<768x128xbf16>
    %cst = arith.constant dense<0.000000e+00> : vector<8x128xf32>
    %2 = tpu.matmul %0, %1, %cst {dimension_numbers = #tpu.dot_dimension_numbers<[1], [0], [0], [1], [0, 0, 1, 1], [], []>} : vector<8x768xbf16>, vector<768x128xbf16>, vector<8x128xf32> -> vector<8x128xf32>
    %3 = arith.mulf %2, %2 : vector<8x128xf32>
    %cst_3 = arith.constant dense<0.000000e+00> : vector<8xf32>
    %4 = vector.multi_reduction <add>, %3, %cst_3 [1] : vector<8x128xf32> to vector<8xf32>
    %5 = vector.shape_cast %4 : vector<8xf32> to vector<8x1xf32>
    %6 = arith.truncf %2 : vector<8x128xf32> to vector<8x128xbf16>
    %c0_4 = arith.constant 0 : index
    %c0_5 = arith.constant 0 : index
    %7 = vector.load %arg3[%c0_4, %c0_5] : memref<128x128xbf16, #tpu.memory_space<vmem>>, vector<128x128xbf16>
    %cst_6 = arith.constant dense<0.000000e+00> : vector<8x128xf32>
    %8 = tpu.matmul %6, %7, %cst_6 {dimension_numbers = #tpu.dot_dimension_numbers<[1], [0], [0], [1], [0, 0, 1, 1], [], []>} : vector<8x128xbf16>, vector<128x128xbf16>, vector<8x128xf32> -> vector<8x128xf32>
    %c0_7 = arith.constant 0 : index
    %c0_8 = arith.constant 0 : index
    %9 = vector.load %arg4[%c0_7, %c0_8] : memref<1x128xf32, #tpu.memory_space<vmem>>, vector<1x128xf32>
    %10 = vector.broadcast %5 : vector<8x1xf32> to vector<8x128xf32>
    %11 = vector.broadcast %9 : vector<1x128xf32> to vector<8x128xf32>
    %12 = arith.addf %10, %11 : vector<8x128xf32>
    %cst_9 = arith.constant 2.000000e+00 : f32
    %13 = vector.broadcast %cst_9 : f32 to vector<8x128xf32>
    %14 = arith.mulf %13, %8 : vector<8x128xf32>
    %15 = arith.subf %12, %14 : vector<8x128xf32>
    %cst_10 = arith.constant 0.000000e+00 : f32
    %16 = vector.broadcast %cst_10 : f32 to vector<8x128xf32>
    %17 = arith.maximumf %15, %16 : vector<8x128xf32>
    %cst_11 = arith.constant 0.000000e+00 : f32
    %18 = vector.broadcast %cst_11 : f32 to vector<8x128xf32>
    %19 = arith.subf %18, %17 : vector<8x128xf32>
    %20 = math.exp %19 : vector<8x128xf32>
    %21 = arith.truncf %20 : vector<8x128xf32> to vector<8x128xbf16>
    %c0_12 = arith.constant 0 : index
    %c0_13 = arith.constant 0 : index
    %22 = vector.load %arg5[%c0_12, %c0_13] : memref<128x128xbf16, #tpu.memory_space<vmem>>, vector<128x128xbf16>
    %cst_14 = arith.constant dense<0.000000e+00> : vector<8x128xf32>
    %23 = tpu.matmul %21, %22, %cst_14 {dimension_numbers = #tpu.dot_dimension_numbers<[1], [0], [0], [1], [0, 0, 1, 1], [], []>} : vector<8x128xbf16>, vector<128x128xbf16>, vector<8x128xf32> -> vector<8x128xf32>
    %c0_15 = arith.constant 0 : index
    %c0_16 = arith.constant 0 : index
    %24 = vector.load %arg6[%c0_15, %c0_16] : memref<8x128xf32, #tpu.memory_space<vmem>>, vector<8x128xf32>
    tpu.vector_store %arg6[%c0_15, %c0_16], %23 {strides = array<i32>} : memref<8x128xf32, #tpu.memory_space<vmem>>, vector<8x128xf32>,
    return
  }
  func.func @transform_0(%arg0: i32) -> (i32, i32) {
    %c0_i32 = arith.constant 0 : i32
    %c0_i32_0 = arith.constant 0 : i32
    return %arg0, %c0_i32 : i32, i32
  }
  func.func @transform_1(%arg0: i32) -> (i32, i32) {
    %c0_i32 = arith.constant 0 : i32
    %c0_i32_0 = arith.constant 0 : i32
    %c0_i32_1 = arith.constant 0 : i32
    return %c0_i32, %c0_i32_0 : i32, i32
  }
  func.func @transform_2(%arg0: i32) -> (i32, i32) {
    %c0_i32 = arith.constant 0 : i32
    %c0_i32_0 = arith.constant 0 : i32
    %c0_i32_1 = arith.constant 0 : i32
    return %c0_i32, %c0_i32_0 : i32, i32
  }
  func.func @transform_3(%arg0: i32) -> (i32, i32) {
    %c0_i32 = arith.constant 0 : i32
    %c0_i32_0 = arith.constant 0 : i32
    %c0_i32_1 = arith.constant 0 : i32
    return %c0_i32, %c0_i32_0 : i32, i32
  }
  func.func @transform_4(%arg0: i32) -> (i32, i32) {
    %c0_i32 = arith.constant 0 : i32
    %c0_i32_0 = arith.constant 0 : i32
    %c0_i32_1 = arith.constant 0 : i32
    return %c0_i32, %c0_i32_0 : i32, i32
  }
  func.func @transform_5(%arg0: i32) -> (i32, i32) {
    %c0_i32 = arith.constant 0 : i32
    %c0_i32_0 = arith.constant 0 : i32
    return %arg0, %c0_i32 : i32, i32
  }
}

</mosaic_0001>

<bundles_post_ra>
// kernel: tpu_custom_call.1
= control target key start
LH: loop header
LB: loop body
LE: loop exit
PB: predicated region body
PF: predicated region fallthrough
CT: control target
= control target key end

     0   :  { %10 = vsyncpa [#allocation3], 0  ;;  %s1371_s0 = inlined_call_operand.hbm [shape: bf16[8,768], index: 0, kind: input, shape index: {}]   ;;  %s1372_s1 = inlined_call_operand.hbm [shape: bf16[768,128], index: 1, kind: input, shape index: {}]   ;;  %s1373_s2 = inlined_call_operand.hbm [shape: bf16[128,128], index: 2, kind: input, shape index: {}]   ;;  %s1374_s3 = inlined_call_operand.vmem [shape: f32[1,128], index: 3, kind: input, shape index: {}]   ;;  %s1375_s4 = inlined_call_operand.hbm [shape: bf16[128,128], index: 4, kind: input, shape index: {}]   ;;  %s1376_s5 = inlined_call_operand.hbm [shape: f32[8,128], index: 5, kind: output, shape index: {}]  }
   0x1   :  { %11 = vsyncpa [#allocation6], 0 }
   0x2   :  { %12 = vsyncpa [#allocation9], 0 }
   0x3   :  { %13 = vsyncpa [#allocation4], 0  ;;  %s1242_s18 = smov [#allocation5]   ;;  %s1124_s22 = scalar_lea.hbm %s1372_s1, 6144 }
   0x4   :  { %s29_s19 = sshll.u32 %s1242_s18, 4  ;;  %p1125_p0 = scmp.ne.s32.totalorder %s1372_s1, %s1124_s22  ;;  %s30_s19 = int_to_ptr.vmem [resolvable:$true] %s29_s19 }
   0x5   :  { %p1128_p1 = scmp.lt.u32.totalorder %s1124_s22, %s1372_s1 }
   0x7   :  { %p1130_p2 = pnand %p1128_p1, %p1125_p0 }
   0x9   :  { %1133 = shalt.err (!%p1130_p2)
}
   0xa   :  { %s1134_s27 = scalar_lea.vmem %s30_s19, 6144  ;;  %p1139_p4 = scmp.lt.s32.totalorder %s30_s19, %s30_s19 }
   0xb   :  { %p1135_p3 = scmp.ne.s32.totalorder %s30_s19, %s1134_s27  ;;  %p1140_p5 = scmp.lt.s32.totalorder %s1134_s27, %s1134_s27 }
   0xd   :  { %p1141_p6 = por %p1140_p5, %p1139_p4 }
   0xf   :  { %p1142_p7 = pnand %p1141_p6, %p1135_p3 }
  0x11   :  { %1145 = shalt.err (!%p1142_p7)
}
  0x12   :  { %s1243_s28 = smov 64   ;;  %s1244_s29 = smov 4  }
  0x13   :  { %35 = dma.hbm_to_vmem [thread:$0]  %s1372_s1, 6144, %s30_s19, [#allocation6], %s1243_s28, %s1243_s28, %s1244_s29  }
  0x14   :  { %s1245_s7 = smov [#allocation2]   ;;  %s1246_s9 = smov [#allocation7]  }
  0x15   :  { %s20_s8 = sshll.u32 %s1245_s7, 4  ;;  %s41_s10 = sshll.u32 %s1246_s9, 4  ;;  %s21_s8 = int_to_ptr.vmem [resolvable:$true] %s20_s8  ;;  %s42_s10 = int_to_ptr.vmem [resolvable:$true] %s41_s10 }
  0x16   :  { %s1146_s13 = scalar_lea.hbm %s1371_s0, 384 }
  0x17   :  { %p1147_p8 = scmp.ne.s32.totalorder %s1371_s0, %s1146_s13  ;;  %p1150_p9 = scmp.lt.u32.totalorder %s1146_s13, %s1371_s0 }
  0x19   :  { %p1152_p10 = pnand %p1150_p9, %p1147_p8 }
  0x1b   :  { %1155 = shalt.err (!%p1152_p10)
}
  0x1c   :  { %s1156_s1 = scalar_lea.vmem %s21_s8, 384  ;;  %p1161_p12 = scmp.lt.s32.totalorder %s21_s8, %s21_s8 }
  0x1d   :  { %p1157_p11 = scmp.ne.s32.totalorder %s21_s8, %s1156_s1  ;;  %p1162_p13 = scmp.lt.s32.totalorder %s1156_s1, %s1156_s1 }
  0x1f   :  { %p1163_p0 = por %p1162_p13, %p1161_p12 }
  0x21   :  { %p1164_p1 = pnand %p1163_p0, %p1157_p11 }
  0x23   :  { %1167 = shalt.err (!%p1164_p1)
}
  0x24   :  { %23 = dma.hbm_to_vmem [thread:$0]  %s1371_s0, 384, %s21_s8, [#allocation3]  }
  0x25   :  { %s1168_s22 = scalar_lea.hbm %s1373_s2, 1024 }
  0x26   :  { %p1169_p2 = scmp.ne.s32.totalorder %s1373_s2, %s1168_s22  ;;  %p1172_p3 = scmp.lt.u32.totalorder %s1168_s22, %s1373_s2 }
  0x28   :  { %p1174_p4 = pnand %p1172_p3, %p1169_p2 }
  0x2a   :  { %1177 = shalt.err (!%p1174_p4)
}
  0x2b   :  { %s1178_s27 = scalar_lea.vmem %s42_s10, 1024  ;;  %p1183_p6 = scmp.lt.s32.totalorder %s42_s10, %s42_s10 }
  0x2c   :  { %p1179_p5 = scmp.ne.s32.totalorder %s42_s10, %s1178_s27  ;;  %p1184_p7 = scmp.lt.s32.totalorder %s1178_s27, %s1178_s27 }
  0x2e   :  { %p1185_p8 = por %p1184_p7, %p1183_p6 }
  0x30   :  { %p1186_p9 = pnand %p1185_p8, %p1179_p5 }
  0x32   :  { %1189 = shalt.err (!%p1186_p9)
}
  0x33   :  { %47 = dma.hbm_to_vmem [thread:$0]  %s1373_s2, 1024, %s42_s10, [#allocation6], %s1243_s28, %s1243_s28, %s1244_s29  }
  0x34   :  { %s1247_s6 = smov [#allocation8]   ;;  %s1190_s11 = scalar_lea.hbm %s1375_s4, 1024 }
  0x35   :  { %s55_s7 = sshll.u32 %s1247_s6, 4  ;;  %p1191_p10 = scmp.ne.s32.totalorder %s1375_s4, %s1190_s11  ;;  %s56_s7 = int_to_ptr.vmem [resolvable:$true] %s55_s7 }
  0x36   :  { %p1194_p11 = scmp.lt.u32.totalorder %s1190_s11, %s1375_s4 }
  0x38   :  { %p1196_p12 = pnand %p1194_p11, %p1191_p10 }
  0x3a   :  { %1199 = shalt.err (!%p1196_p12)
}
  0x3b   :  { %s1200_s16 = scalar_lea.vmem %s56_s7, 1024  ;;  %p1205_p0 = scmp.lt.s32.totalorder %s56_s7, %s56_s7 }
  0x3c   :  { %p1201_p13 = scmp.ne.s32.totalorder %s56_s7, %s1200_s16  ;;  %p1206_p1 = scmp.lt.s32.totalorder %s1200_s16, %s1200_s16 }
  0x3e   :  { %p1207_p2 = por %p1206_p1, %p1205_p0 }
  0x40   :  { %p1208_p3 = pnand %p1207_p2, %p1201_p13 }
  0x42   :  { %1211 = shalt.err (!%p1208_p3)
}
  0x43   :  { %61 = dma.hbm_to_vmem [thread:$0]  %s1375_s4, 1024, %s56_s7, [#allocation9], %s1243_s28, %s1243_s28, %s1244_s29  }
  0x44   :  { %1234 = dma.done.wait [#allocation3], 384  }
  0x45   :  { %1235 = vsyncadd [#allocation3], 4294966912 }
  0x46   :  { %1236 = dma.done.wait [#allocation6], 7168  }
  0x47   :  { %1237 = vsyncadd [#allocation6], 4294960128 }
  0x48   :  { %1238 = dma.done.wait [#allocation9], 1024  }
  0x49   :  { %1239 = vsyncadd [#allocation9], 4294966272  ;;  %v1052_v0 = vld [vmem:[#allocation5 + $0x40] sm:$0xff]   ;;  %v1056_v4 = vld [vmem:[#allocation5 + $0x48] sm:$0xff]   ;;  %v1248_v58 = vmov 0.0   ;;  %vm1249_vm0 = vmmov 0  }
  0x4a   :  { %v1053_v1 = vld [vmem:[#allocation5 + $0xc0] sm:$0xff]   ;;  %919 = vmatprep.subr.bf16.mxu0 %v1052_v0  ;;  %v1057_v5 = vld [vmem:[#allocation5 + $0xc8] sm:$0xff]   ;;  %v1060_v8 = vld [vmem:[#allocation5 + $0x50] sm:$0xff]   ;;  %s1250_s29 = smov [#allocation10]  }
  0x4b   :  { %v1054_v2 = vld [vmem:[#allocation5] sm:$0xff]   ;;  %941 = vmatprep.subr.bf16.mxu1 %v1053_v1  ;;  %v1058_v6 = vld [vmem:[#allocation5 + $0x8] sm:$0xff]   ;;  %v1061_v9 = vld [vmem:[#allocation5 + $0xd0] sm:$0xff]   ;;  %s837_s17 = sshll.u32 %s1250_s29, 4  ;;  %s838_s17 = int_to_ptr.vmem [resolvable:$true] %s837_s17 }
  0x4c   :  { %v1055_v3 = vld [vmem:[#allocation5 + $0x80] sm:$0xff]   ;;  %920 = vmatpush3.bf16.msra.mxu0 %v1054_v2  ;;  %v1059_v7 = vld [vmem:[#allocation5 + $0x88] sm:$0xff]   ;;  %v1062_v10 = vld [vmem:[#allocation5 + $0x10] sm:$0xff]   ;;  %p1217_p5 = scmp.lt.s32.totalorder %s838_s17, %s838_s17 }
  0x4d   :  { %942 = vmatpush3.bf16.msra.mxu1 %v1055_v3  ;;  %921 = vmatprep.subr.bf16.mxu0 %v1056_v4  ;;  %v1063_v11 = vld [vmem:[#allocation5 + $0x90] sm:$0xff]   ;;  %v1064_v12 = vld [vmem:[#allocation5 + $0x58] sm:$0xff]   ;;  %v1068_v16 = vld [vmem:[#allocation5 + $0x60] sm:$0xff]  }
  0x4e   :  { %943 = vmatprep.subr.bf16.mxu1 %v1057_v5  ;;  %v1065_v13 = vld [vmem:[#allocation5 + $0xd8] sm:$0xff]   ;;  %v1069_v17 = vld [vmem:[#allocation5 + $0xe0] sm:$0xff]   ;;  %v1072_v20 = vld [vmem:[#allocation5 + $0x68] sm:$0xff]  }
  0x4f   :  { %v1066_v14 = vld [vmem:[#allocation5 + $0x18] sm:$0xff]   ;;  %v1070_v18 = vld [vmem:[#allocation5 + $0x20] sm:$0xff]   ;;  %v1073_v21 = vld [vmem:[#allocation5 + $0xe8] sm:$0xff]  }
  0x50   :  { %922 = vmatpush3.bf16.msra.mxu0 %v1058_v6  ;;  %v1067_v15 = vld [vmem:[#allocation5 + $0x98] sm:$0xff]   ;;  %v1071_v19 = vld [vmem:[#allocation5 + $0xa0] sm:$0xff]   ;;  %v1074_v22 = vld [vmem:[#allocation5 + $0x28] sm:$0xff]  }
  0x51   :  { %944 = vmatpush3.bf16.msra.mxu1 %v1059_v7  ;;  %923 = vmatprep.subr.bf16.mxu0 %v1060_v8  ;;  %v1075_v23 = vld [vmem:[#allocation5 + $0xa8] sm:$0xff]   ;;  %v1076_v24 = vld [vmem:[#allocation5 + $0x70] sm:$0xff]   ;;  %v1080_v28 = vld [vmem:[#allocation5 + $0x78] sm:$0xff]  }
  0x52   :  { %945 = vmatprep.subr.bf16.mxu1 %v1061_v9  ;;  %v1077_v25 = vld [vmem:[#allocation5 + $0xf0] sm:$0xff]   ;;  %v1081_v29 = vld [vmem:[#allocation5 + $0xf8] sm:$0xff]   ;;  %v75_v32 = vld [vmem:[#allocation2] sm:$0xff] }
  0x53   :  { %v1078_v26 = vld [vmem:[#allocation5 + $0x30] sm:$0xff]   ;;  %v1082_v30 = vld [vmem:[#allocation5 + $0x38] sm:$0xff]   ;;  %v848_v34 = vcombine.low %v75_v32, %v75_v32  ;;  %v849_v35 = vcombine.high %v75_v32, %v75_v32  ;;  %v1088_v38 = vld [vmem:[#allocation5 + $0x140] sm:$0xff]  }
  0x54   :  { %924 = vmatpush3.bf16.msra.mxu0 %v1062_v10  ;;  %v1079_v27 = vld [vmem:[#allocation5 + $0xb0] sm:$0xff]   ;;  %v1083_v31 = vld [vmem:[#allocation5 + $0xb8] sm:$0xff]   ;;  %v1089_v39 = vld [vmem:[#allocation5 + $0x100] sm:$0xff]  }
  0x55   :  { %946 = vmatpush3.bf16.msra.mxu1 %v1063_v11  ;;  %925 = vmatprep.subr.bf16.mxu0 %v1064_v12  ;;  %v76_v33 = vld [vmem:[#allocation2 + $0x8] sm:$0xff]  ;;  %v1090_v40 = vld [vmem:[#allocation5 + $0x148] sm:$0xff]   ;;  %v1094_v44 = vld [vmem:[#allocation5 + $0x158] sm:$0xff]  }
  0x56   :  { %947 = vmatprep.subr.bf16.mxu1 %v1065_v13  ;;  %v850_v36 = vcombine.low %v76_v33, %v76_v33  ;;  %v851_v37 = vcombine.high %v76_v33, %v76_v33  ;;  %515 = vmatprep.mubr.bf16.mxu0 %v849_v35  ;;  %v1091_v41 = vld [vmem:[#allocation5 + $0x108] sm:$0xff]   ;;  %v1092_v42 = vld [vmem:[#allocation5 + $0x150] sm:$0xff]   ;;  %v1095_v45 = vld [vmem:[#allocation5 + $0x118] sm:$0xff]  }
  0x57   :  { %v1093_v43 = vld [vmem:[#allocation5 + $0x110] sm:$0xff]   ;;  %v1096_v46 = vld [vmem:[#allocation5 + $0x160] sm:$0xff]   ;;  %v77_v48 = vld [vmem:[#allocation2 + $0x10] sm:$0xff] }
  0x58   :  { %926 = vmatpush3.bf16.msra.mxu0 %v1066_v14  ;;  %555 = vmatprep.mubr.bf16.mxu1 %v851_v37  ;;  %v1097_v47 = vld [vmem:[#allocation5 + $0x120] sm:$0xff]   ;;  %v1098_v49 = vld [vmem:[#allocation5 + $0x168] sm:$0xff]   ;;  %v853_v50 = vcombine.high %v77_v48, %v77_v48  ;;  %v1100_v52 = vld [vmem:[#allocation5 + $0x170] sm:$0xff]   ;;  %v852_v56 = vcombine.low %v77_v48, %v77_v48 }
  0x59   :  { %948 = vmatpush3.bf16.msra.mxu1 %v1067_v15  ;;  %927 = vmatprep.subr.bf16.mxu0 %v1068_v16  ;;  %v1099_v51 = vld [vmem:[#allocation5 + $0x128] sm:$0xff]   ;;  %v1101_v53 = vld [vmem:[#allocation5 + $0x130] sm:$0xff]   ;;  %v1102_v54 = vld [vmem:[#allocation5 + $0x178] sm:$0xff]  }
  0x5a   :  { %949 = vmatprep.subr.bf16.mxu1 %v1069_v17  ;;  %v1103_v55 = vld [vmem:[#allocation5 + $0x138] sm:$0xff]   ;;  %v1106_v57 = vld [vmem:[#allocation7] sm:$0xff]   ;;  %v1107_v59 = vld [vmem:[#allocation7 + $0x8] sm:$0xff]  }
  0x5b   :  { %v1108_v60 = vld [vmem:[#allocation7 + $0x10] sm:$0xff]   ;;  %v1109_v61 = vld [vmem:[#allocation7 + $0x18] sm:$0xff]   ;;  %v1110_v62 = vld [vmem:[#allocation7 + $0x20] sm:$0xff]  }
  0x5c   :  { %928 = vmatpush3.bf16.msra.mxu0 %v1070_v18  ;;  %v1111_v63 = vld [vmem:[#allocation7 + $0x28] sm:$0xff]   ;;  %v1112_v0 = vld [vmem:[#allocation7 + $0x30] sm:$0xff]   ;;  %v1113_v1 = vld [vmem:[#allocation7 + $0x38] sm:$0xff]  }
  0x5d   :  { %950 = vmatpush3.bf16.msra.mxu1 %v1071_v19  ;;  %929 = vmatprep.subr.bf16.mxu0 %v1072_v20 }
  0x5e   :  { %951 = vmatprep.subr.bf16.mxu1 %v1073_v21  ;;  %v1114_v21 = vld [vmem:[#allocation8] sm:$0xff]  }
  0x60   :  { %930 = vmatpush3.bf16.msra.mxu0 %v1074_v22  ;;  %v1115_v22 = vld [vmem:[#allocation8 + $0x8] sm:$0xff]  }
  0x61   :  { %952 = vmatpush3.bf16.msra.mxu1 %v1075_v23  ;;  %931 = vmatprep.subr.bf16.mxu0 %v1076_v24  ;;  %v1116_v23 = vld [vmem:[#allocation8 + $0x10] sm:$0xff]   ;;  %v1117_v24 = vld [vmem:[#allocation8 + $0x18] sm:$0xff]  }
  0x62   :  { %953 = vmatprep.subr.bf16.mxu1 %v1077_v25  ;;  %v1118_v25 = vld [vmem:[#allocation8 + $0x20] sm:$0xff]  }
  0x64   :  { %932 = vmatpush3.bf16.msra.mxu0 %v1078_v26  ;;  %v1119_v26 = vld [vmem:[#allocation8 + $0x28] sm:$0xff]  }
  0x65   :  { %954 = vmatpush3.bf16.msra.mxu1 %v1079_v27  ;;  %933 = vmatprep.subr.bf16.mxu0 %v1080_v28  ;;  %v1120_v27 = vld [vmem:[#allocation8 + $0x30] sm:$0xff]   ;;  %v1121_v28 = vld [vmem:[#allocation8 + $0x38] sm:$0xff]  }
  0x66   :  { %955 = vmatprep.subr.bf16.mxu1 %v1081_v29 }
  0x68   :  { %934 = vmatpush3.bf16.msra.mxu0 %v1082_v30  ;;  %v910_v30 = vld [vmem:[%s1374_s3] ss:$0 sm:$0xff]  ;;  %s1212_s3 = scalar_lea.vmem %s838_s17, 128 }
  0x69   :  { %956 = vmatpush3.bf16.msra.mxu1 %v1083_v31  ;;  %963 = vmatprep.subr.bf16.mxu0 %v1088_v38  ;;  %p1213_p4 = scmp.ne.s32.totalorder %s838_s17, %s1212_s3  ;;  %p1218_p6 = scmp.lt.s32.totalorder %s1212_s3, %s1212_s3 }
  0x6a   :  { %1003 = vmatprep.subr.bf16.mxu1 %v1248_v58 }
  0x6b   :  { %516 = vmatmul.mubr.bf16.vlgmr.msra.gmra.mrb[0].mxu0 %v848_v34  ;;  %p1219_p7 = por %p1218_p6, %p1217_p5 }
  0x6c   :  { %556 = vmatmul.mubr.bf16.vlgmr.msra.gmra.mrb[0].mxu1 %v850_v36  ;;  %964 = vmatpush3.bf16.msra.mxu0 %v1089_v39 }
  0x6d   :  { %965 = vmatprep.subr.bf16.mxu0 %v1090_v40  ;;  %595 = vmatprep.mubr.bf16.mxu0 %v853_v50  ;;  %p1220_p8 = pnand %p1219_p7, %p1213_p4 }
  0x6e   :  { %1004 = vmatpush3.bf16.msra.mxu1 %v1106_v57  ;;  %1019 = vmatprep.mubr.msk.bf16.mxu1 %vm1249_vm0, %v1248_v58 }
  0x6f   :  { %1005 = vmatprep.subr.bf16.mxu1 %v1248_v58 }
  0x70   :  { %966 = vmatpush3.bf16.msra.mxu0 %v1091_v41 }
  0x71   :  { %967 = vmatprep.subr.bf16.mxu0 %v1092_v42 }
  0x72   :  { %1006 = vmatpush3.bf16.msra.mxu1 %v1107_v59 }
  0x73   :  { %1007 = vmatprep.subr.bf16.mxu1 %v1248_v58 }
  0x74   :  { %968 = vmatpush3.bf16.msra.mxu0 %v1093_v43 }
  0x75   :  { %969 = vmatprep.subr.bf16.mxu0 %v1094_v44 }
  0x76   :  { %1008 = vmatpush3.bf16.msra.mxu1 %v1108_v60 }
  0x77   :  { %1009 = vmatprep.subr.bf16.mxu1 %v1248_v58 }
  0x78   :  { %970 = vmatpush3.bf16.msra.mxu0 %v1095_v45 }
  0x79   :  { %971 = vmatprep.subr.bf16.mxu0 %v1096_v46 }
  0x7a   :  { %1010 = vmatpush3.bf16.msra.mxu1 %v1109_v61 }
  0x7b   :  { %1011 = vmatprep.subr.bf16.mxu1 %v1248_v58 }
  0x7c   :  { %972 = vmatpush3.bf16.msra.mxu0 %v1097_v47 }
  0x7d   :  { %973 = vmatprep.subr.bf16.mxu0 %v1098_v49 }
  0x7e   :  { %1012 = vmatpush3.bf16.msra.mxu1 %v1110_v62 }
  0x7f   :  { %1013 = vmatprep.subr.bf16.mxu1 %v1248_v58 }
  0x80   :  { %974 = vmatpush3.bf16.msra.mxu0 %v1099_v51 }
  0x81   :  { %975 = vmatprep.subr.bf16.mxu0 %v1100_v52 }
  0x82   :  { %1014 = vmatpush3.bf16.msra.mxu1 %v1111_v63 }
  0x83   :  { %1015 = vmatprep.subr.bf16.mxu1 %v1248_v58 }
  0x84   :  { %976 = vmatpush3.bf16.msra.mxu0 %v1101_v53 }
  0x85   :  { %977 = vmatprep.subr.bf16.mxu0 %v1102_v54 }
  0x86   :  { %1016 = vmatpush3.bf16.msra.mxu1 %v1112_v0 }
  0x87   :  { %1017 = vmatprep.subr.bf16.mxu1 %v1248_v58 }
  0x88   :  { %978 = vmatpush3.bf16.msra.mxu0 %v1103_v55 }
  0x89   :  { %1023 = vmatprep.subr.bf16.mxu0 %v1248_v58 }
  0x8a   :  { %1018 = vmatpush3.bf16.msra.mxu1 %v1113_v1 }
  0x8b   :  { %596 = vmatmul.mubr.bf16.vlgmr.msra.gmra.mrb[4].mxu0 %v852_v56 }
  0x8c   :  { %1039 = vmatprep.mubr.msk.bf16.mxu0 %vm1249_vm0, %v1248_v58  ;;  %1024 = vmatpush3.bf16.msra.mxu0 %v1114_v21 }
  0x8d   :  { %1025 = vmatprep.subr.bf16.mxu0 %v1248_v58 }
  0x90   :  { %1026 = vmatpush3.bf16.msra.mxu0 %v1115_v22 }
  0x91   :  { %1027 = vmatprep.subr.bf16.mxu0 %v1248_v58 }
  0x94   :  { %1028 = vmatpush3.bf16.msra.mxu0 %v1116_v23 }
  0x95   :  { %1029 = vmatprep.subr.bf16.mxu0 %v1248_v58 }
  0x98   :  { %1030 = vmatpush3.bf16.msra.mxu0 %v1117_v24 }
  0x99   :  { %1031 = vmatprep.subr.bf16.mxu0 %v1248_v58 }
  0x9c   :  { %1032 = vmatpush3.bf16.msra.mxu0 %v1118_v25 }
  0x9d   :  { %1033 = vmatprep.subr.bf16.mxu0 %v1248_v58 }
  0xa0   :  { %1034 = vmatpush3.bf16.msra.mxu0 %v1119_v26 }
  0xa1   :  { %1035 = vmatprep.subr.bf16.mxu0 %v1248_v58 }
  0xa4   :  { %1036 = vmatpush3.bf16.msra.mxu0 %v1120_v27 }
  0xa5   :  { %1037 = vmatprep.subr.bf16.mxu0 %v1248_v58 }
  0xa8   :  { %1038 = vmatpush3.bf16.msra.mxu0 %v1121_v28 }
 0x13e   :  { %v935_v2 = vpop.f32.mrb[0].mxu0 }
 0x13f   :  { %v957_v3 = vpop.f32.mrb[0].mxu1  ;;  %v936_v4 = vpop.f32.mrb[1].mxu0 }
 0x140   :  { %v958_v5 = vpop.f32.mrb[1].mxu1  ;;  %v937_v6 = vadd.f32 %v936_v4, %v935_v2  ;;  %v938_v8 = vpop.f32.mrb[2].mxu0 }
 0x141   :  { %v959_v7 = vadd.f32 %v958_v5, %v957_v3  ;;  %v960_v9 = vpop.f32.mrb[2].mxu1  ;;  %v939_v10 = vpop.f32.mrb[3].mxu0 }
 0x142   :  { %v961_v11 = vpop.f32.mrb[3].mxu1 }
 0x143   :  { %v558_v12 = vadd.f32 %v959_v7, %v937_v6 }
 0x15e   :  { %v979_v13 = vpop.f32.mrb[4].mxu0 }
 0x15f   :  { %v980_v14 = vpop.f32.mrb[5].mxu0 }
 0x160   :  { %v981_v15 = vadd.f32 %v980_v14, %v979_v13  ;;  %v982_v16 = vpop.f32.mrb[6].mxu0 }
 0x161   :  { %v983_v17 = vpop.f32.mrb[7].mxu0 }
 0x162   :  { %v598_v18 = vadd.f32 %v981_v15, %v558_v12 }
 0x164   :  { %v603_v19 = vmul.f32 %v598_v18, %v598_v18  ;;  %v606_v20 = vpack.c.bf16 %v598_v18, %v598_v18 }
 0x166   :  { %604 = vadd.xlane.f32.xlu0 %v603_v19  ;;  %1020 = vmatmul.mubr.bf16.vlgmr.msra.gmra.mrb[4].mxu1 %v606_v20 }
 0x1f3   :  { %v605_v29 = vpop.xlane.xlu0 %604 }
 0x1f4   :  { %v718_v32 = vadd.f32 %v910_v30, %v605_v29 }
 0x239   :  { %v705_v31 = vpop.f32.mrb[4].mxu1 }
 0x23a   :  { %v719_v33 = vmul.f32 2.0, %v705_v31  ;;  %v1021_v34 = vpop.f32.mrb[5].mxu1 }
 0x23b   :  { %v708_v35 = vpop.f32.mrb[6].mxu1 }
 0x23c   :  { %v720_v36 = vsub.f32 %v718_v32, %v719_v33  ;;  %v1022_v37 = vpop.f32.mrb[7].mxu1 }
 0x23e   :  { %v721_v38 = vmax.f32 %v720_v36, 0.0 }
 0x240   :  { %v722_v39 = vsub.f32 0.0, %v721_v38 }
 0x242   :  { %v723_v40 = vmul.f32 1.442695, %v722_v39 }
 0x244   :  { %1122 = vpow2.f32 %v723_v40 }
 0x24e   :  { %v1123_v41 = vpop.eup %1122 }
 0x24f   :  { %v725_v42 = vpack.c.bf16 %v1123_v41, %v1123_v41 }
 0x251   :  { %1040 = vmatmul.mubr.bf16.vlgmr.msra.gmra.mrb[8].mxu0 %v725_v42 }
 0x324   :  { %v824_v43 = vpop.f32.mrb[8].mxu0 }
 0x325   :  { %830 = vst [vmem:[#allocation10] sm:$0xff] %v824_v43  ;;  %v1041_v44 = vpop.f32.mrb[9].mxu0 }
 0x326   :  { %v827_v45 = vpop.f32.mrb[10].mxu0 }
 0x327   :  { %1223 = shalt.err (!%p1220_p8)
}
 0x328   :  { %s1224_s19 = scalar_lea.hbm %s1376_s5, 128 }
 0x329   :  { %p1225_p9 = scmp.ne.s32.totalorder %s1376_s5, %s1224_s19  ;;  %p1228_p10 = scmp.lt.u32.totalorder %s1224_s19, %s1376_s5 }
 0x32b   :  { %p1230_p11 = pnand %p1228_p10, %p1225_p9 }
 0x32d   :  { %1233 = shalt.err (!%p1230_p11)
}
 0x32e   :  { %840 = dma.vmem_to_hbm [thread:$0]  %s838_s17, 128, %s1376_s5, [#allocation4]   ;;  %v1042_v46 = vpop.f32.mrb[11].mxu0 }
 0x32f   :  { %1240 = dma.done.wait [#allocation4], 128  }
 0x330   :  { %1241 = vsyncadd [#allocation4], 4294967168 }
 0x331   :  { %844 = vsyncpa [#allocation3], 1 }
 0x332   :  { %845 = vsyncpa [#allocation6], 1 }
 0x333   :  { %846 = vsyncpa [#allocation9], 1 }
 0x334   :  { %847 = vsyncpa [#allocation4], 1 }

</bundles_post_ra>
